<compile_context>
chip_gen: v7x
topology: tpu7x:2x2x1
jax: 0.10.0
libtpu: 0.0.40
codegen_flags: <defaults>
</compile_context>

<pallas_src>
import functools

import jax
import jax.numpy as jnp
from jax.experimental import pallas as pl
from jax.experimental.pallas import tpu as pltpu


def _linear_kernel(x_ref, w_ref, b_ref, o_ref, *, compute_dtype):
    # x_ref: (tm, K)  w_ref: (K, tn)  b_ref: (1, tn) fp32  o_ref: (tm, tn)
    x = x_ref[...]
    w = w_ref[...]
    if compute_dtype is not None:
        # In-kernel cast (VPU) — avoids a wrapper-side XLA convert pass over x / W.
        x = x.astype(compute_dtype)
        w = w.astype(compute_dtype)
    acc = jnp.dot(x, w, preferred_element_type=jnp.float32)   # fp32 MXU accumulation
    o_ref[...] = (acc + b_ref[...]).astype(o_ref.dtype)       # fp32 bias add


def _vmem_capacity_bytes() -> int:
    try:
        return int(pltpu.get_tpu_info().vmem_capacity_bytes)
    except Exception:
        return 64 * 1024 * 1024  # conservative per-core default (v7x-sized)


# Biased toward 256-multiples (v6e/v7x MXU is 256x256); 128 multiples still fine on v5e.
_TM_CANDIDATES = (1024, 768, 512, 384, 256, 128, 64, 32, 16, 8)
_TN_CANDIDATES = (1024, 768, 512, 384, 256, 128)


def _plan_tiles(M, N, K, x_isz, w_isz, o_isz, budget, tm, tn):
    """Returns (tm, tn, resident_w, m_outer, working_bytes)."""
    bias_bytes = 4 * N

    def resident_bytes(tm_c):
        # W + bias (conservatively assume double-buffered) + double-buffered x/out tiles.
        return (2 * (K * N * w_isz + bias_bytes)
                + 2 * tm_c * (K * x_isz + N * o_isz))

    def tile_bytes(tm_c, tn_c):
        return 2 * (tm_c * K * x_isz + K * tn_c * w_isz
                    + tm_c * tn_c * o_isz + tn_c * 4)

    forced_resident = tn is not None and tn >= N

    # --- Path 1: whole weight resident in VMEM -> 1-D grid over M tiles. ---
    if tn is None or forced_resident:
        tm_cands = (tm,) if tm is not None else _TM_CANDIDATES
        for c in tm_cands:
            tm_c = min(c, M)
            if forced_resident or resident_bytes(tm_c) <= budget:
                return tm_c, N, True, True, resident_bytes(tm_c)

    # --- Path 2: 2-D grid; stream the smaller operand repeatedly. ---
    tm_cands = (tm,) if tm is not None else _TM_CANDIDATES
    tn_cands = (tn,) if (tn is not None and tn < N) else _TN_CANDIDATES
    best = None
    for cm in tm_cands:
        for cn in tn_cands:
            tm_c, tn_c = min(cm, M), min(cn, N)
            if tile_bytes(tm_c, tn_c) <= budget:
                key = (tm_c * tn_c, tn_c)   # biggest tile, lane-dense tie-break
                if best is None or key > best[0]:
                    best = (key, tm_c, tn_c)
    if best is None:
        tm_c = min(tm if tm is not None else 128, M)
        tn_c = min(tn if tn is not None else 128, N)
    else:
        _, tm_c, tn_c = best

    grid_m, grid_n = pl.cdiv(M, tm_c), pl.cdiv(N, tn_c)
    x_bytes, w_bytes = M * K * x_isz, K * N * w_isz
    # M-outer/N-inner: x read once, W re-read grid_m times.  N-outer/M-inner: opposite.
    m_outer = (x_bytes + grid_m * w_bytes) <= (w_bytes + grid_n * x_bytes)
    return tm_c, tn_c, False, m_outer, tile_bytes(tm_c, tn_c)


def linear_projector(x, w, b, *, compute_dtype=None, out_dtype=None, tm=None, tn=None):
    """y = x @ w + b, with x: [..., K], w: [K, N], b: [N].

    compute_dtype: optionally cast x and w inside the kernel (e.g. jnp.bfloat16) for the
                   MXU; accumulation and the bias add stay in fp32.
    out_dtype:     output dtype (defaults to x.dtype); bf16 halves writeback bytes.
    """
    orig_shape = x.shape
    K = orig_shape[-1]
    Kw, N = w.shape
    assert Kw == K, (Kw, K)
    out_dtype = out_dtype if out_dtype is not None else x.dtype

    x2 = x.reshape(-1, K)            # free: contiguous collapse of leading dims
    M = x2.shape[0]

    x_isz = jnp.dtype(x2.dtype).itemsize
    w_isz = jnp.dtype(w.dtype).itemsize
    o_isz = jnp.dtype(out_dtype).itemsize

    capacity = _vmem_capacity_bytes()
    tile_budget = (2 * capacity) // 5            # ~40% of per-core VMEM for tiles

    tm, tn, resident, m_outer, working_bytes = _plan_tiles(
        M, N, K, x_isz, w_isz, o_isz, tile_budget, tm, tn)

    grid_m = pl.cdiv(M, tm)
    grid_n = pl.cdiv(N, tn)

    b2 = b.reshape(1, N).astype(jnp.float32)     # bias in fp32 (N*4 bytes, negligible)

    kernel = functools.partial(_linear_kernel, compute_dtype=compute_dtype)

    x_bytes, w_bytes, out_bytes = M * K * x_isz, K * N * w_isz, M * N * o_isz

    if resident:
        # W & bias DMA'd once (block index constant); x / out streamed exactly once.
        grid = (grid_m,)
        in_specs = [
            pl.BlockSpec((tm, K), lambda i: (i, 0)),
            pl.BlockSpec((K, N), lambda i: (0, 0)),
            pl.BlockSpec((1, N), lambda i: (0, 0)),
        ]
        out_specs = pl.BlockSpec((tm, N), lambda i: (i, 0))
        semantics = ("parallel",)                 # megacore split lands on M tiles
        bytes_accessed = x_bytes + w_bytes + 4 * N + out_bytes
    elif m_outer:
        # x resident across the inner N sweep; W re-read per M tile.
        grid = (grid_m, grid_n)
        in_specs = [
            pl.BlockSpec((tm, K), lambda i, j: (i, 0)),
            pl.BlockSpec((K, tn), lambda i, j: (0, j)),
            pl.BlockSpec((1, tn), lambda i, j: (0, j)),
        ]
        out_specs = pl.BlockSpec((tm, tn), lambda i, j: (i, j))
        semantics = ("parallel", "parallel")
        bytes_accessed = x_bytes + grid_m * (w_bytes + 4 * N) + out_bytes
    else:
        # W resident across the inner M sweep; x re-read per N tile.
        grid = (grid_n, grid_m)
        in_specs = [
            pl.BlockSpec((tm, K), lambda j, i: (i, 0)),
            pl.BlockSpec((K, tn), lambda j, i: (0, j)),
            pl.BlockSpec((1, tn), lambda j, i: (0, j)),
        ]
        out_specs = pl.BlockSpec((tm, tn), lambda j, i: (i, j))
        semantics = ("parallel", "parallel")
        bytes_accessed = grid_n * x_bytes + w_bytes + 4 * N + out_bytes

    vmem_limit = int(max(32 * 1024 * 1024,
                         min(int(capacity * 0.72),
                             working_bytes + 16 * 1024 * 1024)))

    cost = pl.CostEstimate(flops=2 * M * K * N, transcendentals=0,
                           bytes_accessed=int(bytes_accessed))

    out = pl.pallas_call(
        kernel,
        out_shape=jax.ShapeDtypeStruct((M, N), out_dtype),
        grid_spec=pltpu.PrefetchScalarGridSpec(
            num_scalar_prefetch=0,
            grid=grid,
            in_specs=in_specs,
            out_specs=out_specs,
        ),
        compiler_params=pltpu.CompilerParams(
            dimension_semantics=semantics,
            vmem_limit_bytes=vmem_limit,
        ),
        cost_estimate=cost,
    )(x2, w, b2)

    return out.reshape(*orig_shape[:-1], N)


if __name__ == "__main__":
    key = jax.random.PRNGKey(0)
    kx, kw, kb = jax.random.split(key, 3)

    # img_patches: [B=2, S=8, vision_dim=128] -> [2, 8, llm_dim=256]
    B, S, vision_dim, llm_dim = 2, 8, 128, 256
    x = jax.random.normal(kx, (B, S, vision_dim), dtype=jnp.float32)
    w = jax.random.normal(kw, (vision_dim, llm_dim), dtype=jnp.float32) * 0.02
    b = jax.random.normal(kb, (llm_dim,), dtype=jnp.float32) * 0.02

    # fp32 path (resident-W, 1-D grid over M).
    y = jax.block_until_ready(linear_projector(x, w, b))
    y_ref = x @ w + b
    assert y.shape == (B, S, llm_dim)
    assert jnp.allclose(y, y_ref, atol=1e-4, rtol=1e-4)

    # Non-divisible M and N: exercises masked edge blocks (no wrapper pad / slice copies).
    x_odd = jax.random.normal(kx, (2, 7, vision_dim), dtype=jnp.float32)
    w_odd = jax.random.normal(kw, (vision_dim, 192), dtype=jnp.float32) * 0.02
    b_odd = jax.random.normal(kb, (192,), dtype=jnp.float32) * 0.02
    y_odd = jax.block_until_ready(linear_projector(x_odd, w_odd, b_odd))
    assert y_odd.shape == (2, 7, 192)
    assert jnp.allclose(y_odd, x_odd @ w_odd + b_odd, atol=1e-4, rtol=1e-4)

    # Multi-tile M with a partial last tile (forces the masked M-edge writeback path).
    x_big = jax.random.normal(kx, (25, 12, vision_dim), dtype=jnp.float32)  # M = 300
    y_big = jax.block_until_ready(linear_projector(x_big, w, b, tm=128))
    assert y_big.shape == (25, 12, llm_dim)
    assert jnp.allclose(y_big, x_big @ w + b, atol=1e-4, rtol=1e-4)

    # In-kernel bf16 compute (fp32 accumulation) + bf16 output writeback.
    y_bf16 = jax.block_until_ready(
        linear_projector(x, w, b, compute_dtype=jnp.bfloat16, out_dtype=jnp.bfloat16))
    y_bf16_ref = (x.astype(jnp.bfloat16).astype(jnp.float32)
                  @ w.astype(jnp.bfloat16).astype(jnp.float32) + b)
    assert y_bf16.dtype == jnp.bfloat16
    assert jnp.allclose(y_bf16.astype(jnp.float32), y_bf16_ref, atol=3e-2, rtol=3e-2)

    print("KERNEL_OK")
</pallas_src>

<mosaic_0001>
module attributes {stable_mosaic.version = 11 : i64} {
  func.func @_linear_kernel(%arg0: i32, %arg1: memref<16x128xf32, #tpu.memory_space<vmem>>, %arg2: memref<128x256xf32, #tpu.memory_space<vmem>>, %arg3: memref<1x256xf32, #tpu.memory_space<vmem>>, %arg4: memref<16x256xf32, #tpu.memory_space<vmem>>) attributes {dimension_semantics = [#tpu.dimension_semantics<parallel>], iteration_bounds = array<i64: 1>, scalar_prefetch = 0 : i64, scratch_operands = 0 : i64, tpu.core_type = #tpu.core_type<tc>, window_params = [{transform_indices = @transform_0, window_bounds = array<i64: 16, 128>}, {pipeline_mode = #tpu.pipeline_mode<synchronous>, transform_indices = @transform_1, window_bounds = array<i64: 128, 256>}, {pipeline_mode = #tpu.pipeline_mode<synchronous>, transform_indices = @transform_2, window_bounds = array<i64: 1, 256>}, {transform_indices = @transform_3, window_bounds = array<i64: 16, 256>}]} {
    %c0 = arith.constant 0 : index
    %c0_0 = arith.constant 0 : index
    %0 = vector.load %arg1[%c0, %c0_0] : memref<16x128xf32, #tpu.memory_space<vmem>>, vector<16x128xf32>
    %c0_1 = arith.constant 0 : index
    %c0_2 = arith.constant 0 : index
    %1 = vector.load %arg2[%c0_1, %c0_2] : memref<128x256xf32, #tpu.memory_space<vmem>>, vector<128x256xf32>
    %cst = arith.constant dense<0.000000e+00> : vector<16x256xf32>
    %2 = tpu.matmul %0, %1, %cst {dimension_numbers = #tpu.dot_dimension_numbers<[1], [0], [0], [1], [0, 0, 1, 1], [], []>} : vector<16x128xf32>, vector<128x256xf32>, vector<16x256xf32> -> vector<16x256xf32>
    %c0_3 = arith.constant 0 : index
    %c0_4 = arith.constant 0 : index
    %3 = vector.load %arg3[%c0_3, %c0_4] : memref<1x256xf32, #tpu.memory_space<vmem>>, vector<1x256xf32>
    %4 = vector.broadcast %3 : vector<1x256xf32> to vector<16x256xf32>
    %5 = arith.addf %2, %4 : vector<16x256xf32>
    %c0_5 = arith.constant 0 : index
    %c0_6 = arith.constant 0 : index
    %6 = vector.load %arg4[%c0_5, %c0_6] : memref<16x256xf32, #tpu.memory_space<vmem>>, vector<16x256xf32>
    tpu.vector_store %arg4[%c0_5, %c0_6], %5 {strides = array<i32>} : memref<16x256xf32, #tpu.memory_space<vmem>>, vector<16x256xf32>,
    return
  }
  func.func @transform_0(%arg0: i32) -> (i32, i32) {
    %c0_i32 = arith.constant 0 : i32
    %c0_i32_0 = arith.constant 0 : i32
    return %arg0, %c0_i32 : i32, i32
  }
  func.func @transform_1(%arg0: i32) -> (i32, i32) {
    %c0_i32 = arith.constant 0 : i32
    %c0_i32_0 = arith.constant 0 : i32
    %c0_i32_1 = arith.constant 0 : i32
    return %c0_i32, %c0_i32_0 : i32, i32
  }
  func.func @transform_2(%arg0: i32) -> (i32, i32) {
    %c0_i32 = arith.constant 0 : i32
    %c0_i32_0 = arith.constant 0 : i32
    %c0_i32_1 = arith.constant 0 : i32
    return %c0_i32, %c0_i32_0 : i32, i32
  }
  func.func @transform_3(%arg0: i32) -> (i32, i32) {
    %c0_i32 = arith.constant 0 : i32
    %c0_i32_0 = arith.constant 0 : i32
    return %arg0, %c0_i32 : i32, i32
  }
}

</mosaic_0001>

<bundles_post_ra>
// kernel: tpu_custom_call.1
= control target key start
LH: loop header
LB: loop body
LE: loop exit
PB: predicated region body
PF: predicated region fallthrough
CT: control target
= control target key end

     0   :  { %8 = vsyncpa [#allocation3], 0  ;;  %s389_s0 = inlined_call_operand.hbm [shape: f32[16,128], index: 0, kind: input, shape index: {}]   ;;  %s390_s1 = inlined_call_operand.hbm [shape: f32[128,256], index: 1, kind: input, shape index: {}]   ;;  %s391_s2 = inlined_call_operand.vmem [shape: f32[1,256], index: 2, kind: input, shape index: {}]   ;;  %s392_s3 = inlined_call_operand.hbm [shape: f32[16,256], index: 3, kind: output, shape index: {}]  }
   0x1   :  { %9 = vsyncpa [#allocation6], 0 }
   0x2   :  { %10 = vsyncpa [#allocation4], 0  ;;  %s316_s12 = smov [#allocation2]   ;;  %s244_s16 = scalar_lea.hbm %s389_s0, 256 }
   0x3   :  { %s16_s13 = sshll.u32 %s316_s12, 4  ;;  %p245_p0 = scmp.ne.s32.totalorder %s389_s0, %s244_s16  ;;  %s17_s13 = int_to_ptr.vmem [resolvable:$true] %s16_s13 }
   0x4   :  { %p248_p1 = scmp.lt.u32.totalorder %s244_s16, %s389_s0 }
   0x6   :  { %p250_p2 = pnand %p248_p1, %p245_p0 }
   0x8   :  { %253 = shalt.err (!%p250_p2)
}
   0x9   :  { %s254_s21 = scalar_lea.vmem %s17_s13, 256  ;;  %p259_p4 = scmp.lt.s32.totalorder %s17_s13, %s17_s13 }
   0xa   :  { %p255_p3 = scmp.ne.s32.totalorder %s17_s13, %s254_s21  ;;  %p260_p5 = scmp.lt.s32.totalorder %s254_s21, %s254_s21 }
   0xc   :  { %p261_p6 = por %p260_p5, %p259_p4 }
   0xe   :  { %p262_p7 = pnand %p261_p6, %p255_p3 }
  0x10   :  { %265 = shalt.err (!%p262_p7)
}
  0x11   :  { %s317_s22 = smov 128   ;;  %s318_s23 = smov 8  }
  0x12   :  { %22 = dma.hbm_to_vmem [thread:$0]  %s389_s0, 256, %s17_s13, [#allocation3], %s317_s22, %s317_s22, %s318_s23  }
  0x13   :  { %s319_s26 = smov [#allocation5]   ;;  %s266_s30 = scalar_lea.hbm %s390_s1, 4096 }
  0x14   :  { %s28_s27 = sshll.u32 %s319_s26, 4  ;;  %p267_p8 = scmp.ne.s32.totalorder %s390_s1, %s266_s30  ;;  %s29_s27 = int_to_ptr.vmem [resolvable:$true] %s28_s27 }
  0x15   :  { %p270_p9 = scmp.lt.u32.totalorder %s266_s30, %s390_s1 }
  0x17   :  { %p272_p10 = pnand %p270_p9, %p267_p8 }
  0x19   :  { %275 = shalt.err (!%p272_p10)
}
  0x1a   :  { %s276_s8 = scalar_lea.vmem %s29_s27, 4096  ;;  %p281_p12 = scmp.lt.s32.totalorder %s29_s27, %s29_s27 }
  0x1b   :  { %p277_p11 = scmp.ne.s32.totalorder %s29_s27, %s276_s8  ;;  %p282_p13 = scmp.lt.s32.totalorder %s276_s8, %s276_s8 }
  0x1d   :  { %p283_p0 = por %p282_p13, %p281_p12 }
  0x1f   :  { %p284_p1 = pnand %p283_p0, %p277_p11 }
  0x21   :  { %287 = shalt.err (!%p284_p1)
}
  0x22   :  { %s320_s0 = smov 256   ;;  %s321_s9 = smov 16  }
  0x23   :  { %34 = dma.hbm_to_vmem [thread:$0]  %s390_s1, 4096, %s29_s27, [#allocation6], %s320_s0, %s320_s0, %s321_s9  }
  0x24   :  { %310 = dma.done.wait [#allocation3], 256  }
  0x25   :  { %311 = vsyncadd [#allocation3], 4294967040 }
  0x26   :  { %312 = dma.done.wait [#allocation6], 4096  }
  0x27   :  { %313 = vsyncadd [#allocation6], 4294963200  ;;  %v322_v0 = vmov 0.0   ;;  %v46_v1 = vld [vmem:[#allocation5 + $0x8] sm:$0xff]  ;;  %v48_v2 = vld [vmem:[#allocation5 + $0x18] sm:$0xff]  ;;  %v79_v51 = vlaneseq  ;;  %s323_s13 = smov [#allocation7]  }
  0x28   :  { %153 = vmatprep.mubr.f32.mxu0 %v322_v0  ;;  %159 = vmatprep.mubr.f32.mxu1 %v322_v0  ;;  %v45_v3 = vld [vmem:[#allocation5] sm:$0xff]  ;;  %v188_v4 = vpack.c.bf16 %v48_v2, %v46_v1  ;;  %v47_v5 = vld [vmem:[#allocation5 + $0x10] sm:$0xff]  ;;  %v50_v6 = vld [vmem:[#allocation5 + $0x28] sm:$0xff]  ;;  %s175_s14 = sshll.u32 %s323_s13, 4  ;;  %s176_s14 = int_to_ptr.vmem [resolvable:$true] %s175_s14 }
  0x29   :  { %v52_v7 = vld [vmem:[#allocation5 + $0x38] sm:$0xff]  ;;  %v190_v8 = vpack.c.bf16 %v47_v5, %v45_v3  ;;  %v49_v10 = vld [vmem:[#allocation5 + $0x20] sm:$0xff]  ;;  %v51_v11 = vld [vmem:[#allocation5 + $0x30] sm:$0xff]  ;;  %v80_v52 = vshrl.u32 %v79_v51, 7  ;;  %s288_s15 = scalar_lea.vmem %s176_s14, 512  ;;  %p293_p3 = scmp.lt.s32.totalorder %s176_s14, %s176_s14 }
  0x2a   :  { %v192_v9 = vpack.c.bf16 %v52_v7, %v50_v6  ;;  %v54_v12 = vld [vmem:[#allocation5 + $0x48] sm:$0xff]  ;;  %189 = vmatprep.subr.bf16.mxu0 %v188_v4  ;;  %220 = vmatprep.subr.bf16.mxu1 %v188_v4  ;;  %v56_v13 = vld [vmem:[#allocation5 + $0x58] sm:$0xff]  ;;  %v194_v14 = vpack.c.bf16 %v51_v11, %v49_v10  ;;  %v53_v16 = vld [vmem:[#allocation5 + $0x40] sm:$0xff]  ;;  %p289_p2 = scmp.ne.s32.totalorder %s176_s14, %s288_s15  ;;  %p294_p4 = scmp.lt.s32.totalorder %s288_s15, %s288_s15 }
  0x2b   :  { %191 = vmatpush1.bf16.msra.mxu0 %v190_v8  ;;  %228 = vmatpush1.bf16.msra.mxu1 %v190_v8  ;;  %v196_v15 = vpack.c.bf16 %v56_v13, %v54_v12  ;;  %v55_v17 = vld [vmem:[#allocation5 + $0x50] sm:$0xff]  ;;  %v58_v18 = vld [vmem:[#allocation5 + $0x68] sm:$0xff]  ;;  %v60_v19 = vld [vmem:[#allocation5 + $0x78] sm:$0xff]  ;;  %v81_v53 = vsub.s32 0, %v80_v52  ;;  %v85_v55 = vsub.s32 1, %v80_v52 }
  0x2c   :  { %193 = vmatprep.subr.bf16.mxu0 %v192_v9  ;;  %221 = vmatprep.subr.bf16.mxu1 %v192_v9  ;;  %v198_v20 = vpack.c.bf16 %v55_v17, %v53_v16  ;;  %v200_v21 = vpack.c.bf16 %v60_v19, %v58_v18  ;;  %v57_v22 = vld [vmem:[#allocation5 + $0x60] sm:$0xff]  ;;  %v59_v23 = vld [vmem:[#allocation5 + $0x70] sm:$0xff]  ;;  %v62_v24 = vld [vmem:[#allocation5 + $0x88] sm:$0xff]  ;;  %p295_p5 = por %p294_p4, %p293_p3 }
  0x2d   :  { %v64_v25 = vld [vmem:[#allocation5 + $0x98] sm:$0xff]  ;;  %v202_v26 = vpack.c.bf16 %v59_v23, %v57_v22  ;;  %v61_v28 = vld [vmem:[#allocation5 + $0x80] sm:$0xff]  ;;  %v63_v29 = vld [vmem:[#allocation5 + $0x90] sm:$0xff] }
  0x2e   :  { %v204_v27 = vpack.c.bf16 %v64_v25, %v62_v24  ;;  %v66_v30 = vld [vmem:[#allocation5 + $0xa8] sm:$0xff]  ;;  %v68_v31 = vld [vmem:[#allocation5 + $0xb8] sm:$0xff]  ;;  %v206_v32 = vpack.c.bf16 %v63_v29, %v61_v28  ;;  %v65_v34 = vld [vmem:[#allocation5 + $0xa0] sm:$0xff]  ;;  %p296_p6 = pnand %p295_p5, %p289_p2 }
  0x2f   :  { %195 = vmatpush1.bf16.msra.mxu0 %v194_v14  ;;  %229 = vmatpush1.bf16.msra.mxu1 %v194_v14  ;;  %v208_v33 = vpack.c.bf16 %v68_v31, %v66_v30  ;;  %v67_v35 = vld [vmem:[#allocation5 + $0xb0] sm:$0xff]  ;;  %v70_v36 = vld [vmem:[#allocation5 + $0xc8] sm:$0xff]  ;;  %v72_v37 = vld [vmem:[#allocation5 + $0xd8] sm:$0xff] }
  0x30   :  { %197 = vmatprep.subr.bf16.mxu0 %v196_v15  ;;  %222 = vmatprep.subr.bf16.mxu1 %v196_v15  ;;  %v210_v38 = vpack.c.bf16 %v67_v35, %v65_v34  ;;  %v212_v39 = vpack.c.bf16 %v72_v37, %v70_v36  ;;  %v69_v40 = vld [vmem:[#allocation5 + $0xc0] sm:$0xff]  ;;  %v71_v41 = vld [vmem:[#allocation5 + $0xd0] sm:$0xff]  ;;  %v74_v42 = vld [vmem:[#allocation5 + $0xe8] sm:$0xff] }
  0x31   :  { %v76_v43 = vld [vmem:[#allocation5 + $0xf8] sm:$0xff]  ;;  %v214_v44 = vpack.c.bf16 %v71_v41, %v69_v40  ;;  %v73_v46 = vld [vmem:[#allocation5 + $0xe0] sm:$0xff]  ;;  %v75_v47 = vld [vmem:[#allocation5 + $0xf0] sm:$0xff] }
  0x32   :  { %v216_v45 = vpack.c.bf16 %v76_v43, %v74_v42  ;;  %v218_v48 = vpack.c.bf16 %v75_v47, %v73_v46  ;;  %v43_v49 = vld [vmem:[#allocation2] sm:$0xff]  ;;  %v44_v50 = vld [vmem:[#allocation2 + $0x8] sm:$0xff] }
  0x33   :  { %199 = vmatpush1.bf16.msra.mxu0 %v198_v20  ;;  %230 = vmatpush1.bf16.msra.mxu1 %v198_v20  ;;  %v77_v54 = vld [vmem:[%s391_s2] sm:$0x3] }
  0x34   :  { %201 = vmatprep.subr.bf16.mxu0 %v200_v21  ;;  %223 = vmatprep.subr.bf16.mxu1 %v200_v21  ;;  %v82_v56 = vrot.slane %v77_v54, %v81_v53  ;;  %v86_v57 = vrot.slane %v77_v54, %v85_v55 }
  0x37   :  { %203 = vmatpush1.bf16.msra.mxu0 %v202_v26  ;;  %231 = vmatpush1.bf16.msra.mxu1 %v202_v26 }
  0x38   :  { %205 = vmatprep.subr.bf16.mxu0 %v204_v27  ;;  %224 = vmatprep.subr.bf16.mxu1 %v204_v27 }
  0x3b   :  { %207 = vmatpush1.bf16.msra.mxu0 %v206_v32  ;;  %232 = vmatpush1.bf16.msra.mxu1 %v206_v32 }
  0x3c   :  { %209 = vmatprep.subr.bf16.mxu0 %v208_v33  ;;  %225 = vmatprep.subr.bf16.mxu1 %v208_v33 }
  0x3f   :  { %211 = vmatpush1.bf16.msra.mxu0 %v210_v38  ;;  %233 = vmatpush1.bf16.msra.mxu1 %v210_v38 }
  0x40   :  { %213 = vmatprep.subr.bf16.mxu0 %v212_v39  ;;  %226 = vmatprep.subr.bf16.mxu1 %v212_v39 }
  0x43   :  { %215 = vmatpush1.bf16.msra.mxu0 %v214_v44  ;;  %234 = vmatpush1.bf16.msra.mxu1 %v214_v44 }
  0x44   :  { %217 = vmatprep.subr.bf16.mxu0 %v216_v45  ;;  %227 = vmatprep.subr.bf16.mxu1 %v216_v45 }
  0x47   :  { %219 = vmatpush1.bf16.msra.mxu0 %v218_v48  ;;  %235 = vmatpush1.bf16.msra.mxu1 %v218_v48 }
  0x4a   :  { %154 = vmatmul.mubr.f32.vlgmr.msra.gmra.mrb[0].mxu0 %v43_v49  ;;  %160 = vmatmul.mubr.f32.vlgmr.msra.gmra.mrb[0].mxu1 %v44_v50 }
 0x11d   :  { %v155_v58 = vpop.f32.mrb[0].mxu0  ;;  %v161_v59 = vpop.f32.mrb[0].mxu1 }
 0x11e   :  { %v156_v60 = vadd.f32 %v155_v58, %v82_v56  ;;  %v162_v61 = vadd.f32 %v161_v59, %v82_v56  ;;  %v157_v62 = vpop.f32.mrb[1].mxu0  ;;  %v163_v63 = vpop.f32.mrb[1].mxu1 }
 0x11f   :  { %v158_v0 = vadd.f32 %v157_v62, %v86_v57  ;;  %v164_v1 = vadd.f32 %v163_v63, %v86_v57 }
 0x120   :  { %166 = vst [vmem:[#allocation7] sm:$0xff] %v156_v60  ;;  %168 = vst [vmem:[#allocation7 + $0x10] sm:$0xff] %v162_v61 }
 0x121   :  { %167 = vst [vmem:[#allocation7 + $0x8] sm:$0xff] %v158_v0  ;;  %169 = vst [vmem:[#allocation7 + $0x18] sm:$0xff] %v164_v1 }
 0x122   :  { %299 = shalt.err (!%p296_p6)
}
 0x123   :  { %s300_s17 = scalar_lea.hbm %s392_s3, 512 }
 0x124   :  { %p301_p7 = scmp.ne.s32.totalorder %s392_s3, %s300_s17  ;;  %p304_p8 = scmp.lt.u32.totalorder %s300_s17, %s392_s3 }
 0x126   :  { %p306_p9 = pnand %p304_p8, %p301_p7 }
 0x128   :  { %309 = shalt.err (!%p306_p9)
}
 0x129   :  { %181 = dma.vmem_to_hbm [thread:$0]  %s176_s14, 512, %s392_s3, [#allocation4], %s320_s0, %s320_s0, %s321_s9  }
 0x12a   :  { %314 = dma.done.wait [#allocation4], 512  }
 0x12b   :  { %315 = vsyncadd [#allocation4], 4294966784 }
 0x12c   :  { %185 = vsyncpa [#allocation3], 1 }
 0x12d   :  { %186 = vsyncpa [#allocation6], 1 }
 0x12e   :  { %187 = vsyncpa [#allocation4], 1 }

</bundles_post_ra>
